<compile_context>
chip_gen: v5e
topology: v5e:2x2
jax: 0.10.0
libtpu: 0.0.40
codegen_flags: <defaults>
</compile_context>

<pallas_src>
import jax
import jax.numpy as jnp
from jax.experimental import pallas as pl
from jax.experimental.pallas import tpu as pltpu


def _round_up(x, m):
    return (x + m - 1) // m * m


def _dueling_q_kernel(x_ref, w1_ref, b1_ref, w2_ref, b2_ref, wq_ref, bq_ref, q_ref):
    # x tile: (TM, D_in) f32 -> bf16 in-kernel (no extra wrapper HBM pass).
    x = x_ref[...].astype(jnp.bfloat16)

    # input layer + ReLU (MXU bf16 with f32 accumulate; elementwise stays f32)
    h = jnp.dot(x, w1_ref[...], preferred_element_type=jnp.float32) + b1_ref[...]
    h = jnp.maximum(h, 0.0).astype(jnp.bfloat16)

    # hidden layer + ReLU (lane-dense: K = N = 128)
    h = jnp.dot(h, w2_ref[...], preferred_element_type=jnp.float32) + b2_ref[...]
    h = jnp.maximum(h, 0.0).astype(jnp.bfloat16)

    # dueling head, pre-folded in the wrapper:  Q = h @ Wq + bq
    # (lanes >= O carry zeros; sliced off by the wrapper)
    q_ref[...] = jnp.dot(h, wq_ref[...], preferred_element_type=jnp.float32) + bq_ref[...]


def fc_dueling_q(x, params, *, tile_m=1024):
    """Forward pass of FCDuelingQ. x: (B, D_in) f32. Returns (B, O) f32."""
    w1, b1, w2, b2, wa, ba, wv, bv = params
    B, d_in = x.shape
    h1 = w1.shape[1]
    h2 = w2.shape[1]
    o = wa.shape[1]

    # --- fold the dueling aggregation into the head (in f32, before bf16 cast)
    #   Q = A + V - mean(A)  with  A = h @ wa + ba,  V = h @ wv + bv
    #     = h @ (wa + wv - mean_cols(wa)) + (ba + bv - mean(ba))
    wq = wa + wv - jnp.mean(wa, axis=1, keepdims=True)          # (h2, o)
    bq = ba + bv - jnp.mean(ba, axis=1, keepdims=True)          # (1, o)

    # --- lane-pad hidden/output dims to multiples of 128 (zero padding) -----
    h1p = max(128, _round_up(h1, 128))
    h2p = max(128, _round_up(h2, 128))
    op = max(128, _round_up(o, 128))

    w1p = jnp.zeros((d_in, h1p), jnp.float32).at[:, :h1].set(w1).astype(jnp.bfloat16)
    b1p = jnp.zeros((1, h1p), jnp.float32).at[:, :h1].set(b1)
    w2p = jnp.zeros((h1p, h2p), jnp.float32).at[:h1, :h2].set(w2).astype(jnp.bfloat16)
    b2p = jnp.zeros((1, h2p), jnp.float32).at[:, :h2].set(b2)
    wqp = jnp.zeros((h2p, op), jnp.float32).at[:h2, :o].set(wq).astype(jnp.bfloat16)
    bqp = jnp.zeros((1, op), jnp.float32).at[:, :o].set(bq)

    # --- batch tiling: large tile, multiple of 16; ragged last tile (no pad) -
    tm = min(tile_m, _round_up(max(B, 1), 16))
    tm = _round_up(tm, 16)
    grid_m = pl.cdiv(B, tm)
    b_pad = grid_m * tm   # output rows >= B are garbage, sliced off below

    q_pad = pl.pallas_call(
        _dueling_q_kernel,
        out_shape=jax.ShapeDtypeStruct((b_pad, op), jnp.float32),
        grid_spec=pltpu.PrefetchScalarGridSpec(
            num_scalar_prefetch=0,
            grid=(grid_m,),
            in_specs=[
                pl.BlockSpec((tm, d_in), lambda i: (i, 0)),      # x: tiled over batch
                pl.BlockSpec((d_in, h1p), lambda i: (0, 0)),     # weights stay resident
                pl.BlockSpec((1, h1p), lambda i: (0, 0)),
                pl.BlockSpec((h1p, h2p), lambda i: (0, 0)),
                pl.BlockSpec((1, h2p), lambda i: (0, 0)),
                pl.BlockSpec((h2p, op), lambda i: (0, 0)),
                pl.BlockSpec((1, op), lambda i: (0, 0)),
            ],
            out_specs=pl.BlockSpec((tm, op), lambda i: (i, 0)),  # lane-dense stores
        ),
        compiler_params=pltpu.CompilerParams(
            dimension_semantics=("parallel",)),
    )(x, w1p, b1p, w2p, b2p, wqp, bqp)

    # TODO(synk): in a real pipeline fuse this slice into the consumer instead
    # of materializing (it is an extra HBM pass over the padded Q buffer).
    return q_pad[:B, :o]


def init_params(key, input_dim, output_dim, hidden_dims=(32, 32)):
    """Deterministic synthetic init (PyTorch-Linear-like uniform bounds)."""
    def linear(k, fan_in, fan_out):
        k_w, k_b = jax.random.split(k)
        bound = 1.0 / jnp.sqrt(fan_in)
        w = jax.random.uniform(k_w, (fan_in, fan_out), jnp.float32, -bound, bound)
        b = jax.random.uniform(k_b, (1, fan_out), jnp.float32, -bound, bound)
        return w, b

    k1, k2, k3, k4 = jax.random.split(key, 4)
    w1, b1 = linear(k1, input_dim, hidden_dims[0])        # input_layer
    w2, b2 = linear(k2, hidden_dims[0], hidden_dims[1])   # hidden_layers[0]
    wa, ba = linear(k3, hidden_dims[1], output_dim)       # output_layer (advantage)
    wv, bv = linear(k4, hidden_dims[1], 1)                # output_value (state value)
    return (w1, b1, w2, b2, wa, ba, wv, bv)


def reference(x, params):
    (w1, b1, w2, b2, wa, ba, wv, bv) = params
    h = jnp.maximum(x @ w1 + b1, 0.0)
    h = jnp.maximum(h @ w2 + b2, 0.0)
    a = h @ wa + ba
    v = h @ wv + bv
    return v + a - jnp.mean(a, axis=1, keepdims=True)


if __name__ == "__main__":
    input_dim, output_dim, hidden_dims = 8, 4, (32, 32)
    batch = 2

    key = jax.random.PRNGKey(0)
    k_x, k_p = jax.random.split(key)
    x = jax.random.normal(k_x, (batch, input_dim), jnp.float32)
    params = init_params(k_p, input_dim, output_dim, hidden_dims)

    q = fc_dueling_q(x, params)
    q = jax.block_until_ready(q)

    q_ref = reference(x, params)
    assert q.shape == (batch, output_dim)
    # bf16 matmul operands -> relaxed tolerance vs the f32 reference
    assert jnp.allclose(q, q_ref, atol=5e-2, rtol=5e-2), "mismatch vs reference"

    print("KERNEL_OK")
</pallas_src>

<mosaic_0001>
module attributes {stable_mosaic.version = 11 : i64} {
  func.func @_dueling_q_kernel(%arg0: i32, %arg1: memref<16x8xf32, #tpu.memory_space<vmem>>, %arg2: memref<8x128xbf16, #tpu.memory_space<vmem>>, %arg3: memref<1x128xf32, #tpu.memory_space<vmem>>, %arg4: memref<128x128xbf16, #tpu.memory_space<vmem>>, %arg5: memref<1x128xf32, #tpu.memory_space<vmem>>, %arg6: memref<128x128xbf16, #tpu.memory_space<vmem>>, %arg7: memref<1x128xf32, #tpu.memory_space<vmem>>, %arg8: memref<16x128xf32, #tpu.memory_space<vmem>>) attributes {dimension_semantics = [#tpu.dimension_semantics<parallel>], iteration_bounds = array<i64: 1>, scalar_prefetch = 0 : i64, scratch_operands = 0 : i64, tpu.core_type = #tpu.core_type<tc>, window_params = [{transform_indices = @transform_0, window_bounds = array<i64: 16, 8>}, {pipeline_mode = #tpu.pipeline_mode<synchronous>, transform_indices = @transform_1, window_bounds = array<i64: 8, 128>}, {pipeline_mode = #tpu.pipeline_mode<synchronous>, transform_indices = @transform_2, window_bounds = array<i64: 1, 128>}, {pipeline_mode = #tpu.pipeline_mode<synchronous>, transform_indices = @transform_3, window_bounds = array<i64: 128, 128>}, {pipeline_mode = #tpu.pipeline_mode<synchronous>, transform_indices = @transform_4, window_bounds = array<i64: 1, 128>}, {pipeline_mode = #tpu.pipeline_mode<synchronous>, transform_indices = @transform_5, window_bounds = array<i64: 128, 128>}, {pipeline_mode = #tpu.pipeline_mode<synchronous>, transform_indices = @transform_6, window_bounds = array<i64: 1, 128>}, {transform_indices = @transform_7, window_bounds = array<i64: 16, 128>}]} {
    %c0 = arith.constant 0 : index
    %c0_0 = arith.constant 0 : index
    %0 = vector.load %arg1[%c0, %c0_0] : memref<16x8xf32, #tpu.memory_space<vmem>>, vector<16x8xf32>
    %1 = arith.truncf %0 : vector<16x8xf32> to vector<16x8xbf16>
    %c0_1 = arith.constant 0 : index
    %c0_2 = arith.constant 0 : index
    %2 = vector.load %arg2[%c0_1, %c0_2] : memref<8x128xbf16, #tpu.memory_space<vmem>>, vector<8x128xbf16>
    %cst = arith.constant dense<0.000000e+00> : vector<16x128xf32>
    %3 = tpu.matmul %1, %2, %cst {dimension_numbers = #tpu.dot_dimension_numbers<[1], [0], [0], [1], [0, 0, 1, 1], [], []>} : vector<16x8xbf16>, vector<8x128xbf16>, vector<16x128xf32> -> vector<16x128xf32>
    %c0_3 = arith.constant 0 : index
    %c0_4 = arith.constant 0 : index
    %4 = vector.load %arg3[%c0_3, %c0_4] : memref<1x128xf32, #tpu.memory_space<vmem>>, vector<1x128xf32>
    %5 = vector.broadcast %4 : vector<1x128xf32> to vector<16x128xf32>
    %6 = arith.addf %3, %5 : vector<16x128xf32>
    %cst_5 = arith.constant 0.000000e+00 : f32
    %7 = vector.broadcast %cst_5 : f32 to vector<16x128xf32>
    %8 = arith.maximumf %6, %7 : vector<16x128xf32>
    %9 = arith.truncf %8 : vector<16x128xf32> to vector<16x128xbf16>
    %c0_6 = arith.constant 0 : index
    %c0_7 = arith.constant 0 : index
    %10 = vector.load %arg4[%c0_6, %c0_7] : memref<128x128xbf16, #tpu.memory_space<vmem>>, vector<128x128xbf16>
    %cst_8 = arith.constant dense<0.000000e+00> : vector<16x128xf32>
    %11 = tpu.matmul %9, %10, %cst_8 {dimension_numbers = #tpu.dot_dimension_numbers<[1], [0], [0], [1], [0, 0, 1, 1], [], []>} : vector<16x128xbf16>, vector<128x128xbf16>, vector<16x128xf32> -> vector<16x128xf32>
    %c0_9 = arith.constant 0 : index
    %c0_10 = arith.constant 0 : index
    %12 = vector.load %arg5[%c0_9, %c0_10] : memref<1x128xf32, #tpu.memory_space<vmem>>, vector<1x128xf32>
    %13 = vector.broadcast %12 : vector<1x128xf32> to vector<16x128xf32>
    %14 = arith.addf %11, %13 : vector<16x128xf32>
    %cst_11 = arith.constant 0.000000e+00 : f32
    %15 = vector.broadcast %cst_11 : f32 to vector<16x128xf32>
    %16 = arith.maximumf %14, %15 : vector<16x128xf32>
    %17 = arith.truncf %16 : vector<16x128xf32> to vector<16x128xbf16>
    %c0_12 = arith.constant 0 : index
    %c0_13 = arith.constant 0 : index
    %18 = vector.load %arg6[%c0_12, %c0_13] : memref<128x128xbf16, #tpu.memory_space<vmem>>, vector<128x128xbf16>
    %cst_14 = arith.constant dense<0.000000e+00> : vector<16x128xf32>
    %19 = tpu.matmul %17, %18, %cst_14 {dimension_numbers = #tpu.dot_dimension_numbers<[1], [0], [0], [1], [0, 0, 1, 1], [], []>} : vector<16x128xbf16>, vector<128x128xbf16>, vector<16x128xf32> -> vector<16x128xf32>
    %c0_15 = arith.constant 0 : index
    %c0_16 = arith.constant 0 : index
    %20 = vector.load %arg7[%c0_15, %c0_16] : memref<1x128xf32, #tpu.memory_space<vmem>>, vector<1x128xf32>
    %21 = vector.broadcast %20 : vector<1x128xf32> to vector<16x128xf32>
    %22 = arith.addf %19, %21 : vector<16x128xf32>
    %c0_17 = arith.constant 0 : index
    %c0_18 = arith.constant 0 : index
    %23 = vector.load %arg8[%c0_17, %c0_18] : memref<16x128xf32, #tpu.memory_space<vmem>>, vector<16x128xf32>
    tpu.vector_store %arg8[%c0_17, %c0_18], %22 {strides = array<i32>} : memref<16x128xf32, #tpu.memory_space<vmem>>, vector<16x128xf32>,
    return
  }
  func.func @transform_0(%arg0: i32) -> (i32, i32) {
    %c0_i32 = arith.constant 0 : i32
    %c0_i32_0 = arith.constant 0 : i32
    return %arg0, %c0_i32 : i32, i32
  }
  func.func @transform_1(%arg0: i32) -> (i32, i32) {
    %c0_i32 = arith.constant 0 : i32
    %c0_i32_0 = arith.constant 0 : i32
    %c0_i32_1 = arith.constant 0 : i32
    return %c0_i32, %c0_i32_0 : i32, i32
  }
  func.func @transform_2(%arg0: i32) -> (i32, i32) {
    %c0_i32 = arith.constant 0 : i32
    %c0_i32_0 = arith.constant 0 : i32
    %c0_i32_1 = arith.constant 0 : i32
    return %c0_i32, %c0_i32_0 : i32, i32
  }
  func.func @transform_3(%arg0: i32) -> (i32, i32) {
    %c0_i32 = arith.constant 0 : i32
    %c0_i32_0 = arith.constant 0 : i32
    %c0_i32_1 = arith.constant 0 : i32
    return %c0_i32, %c0_i32_0 : i32, i32
  }
  func.func @transform_4(%arg0: i32) -> (i32, i32) {
    %c0_i32 = arith.constant 0 : i32
    %c0_i32_0 = arith.constant 0 : i32
    %c0_i32_1 = arith.constant 0 : i32
    return %c0_i32, %c0_i32_0 : i32, i32
  }
  func.func @transform_5(%arg0: i32) -> (i32, i32) {
    %c0_i32 = arith.constant 0 : i32
    %c0_i32_0 = arith.constant 0 : i32
    %c0_i32_1 = arith.constant 0 : i32
    return %c0_i32, %c0_i32_0 : i32, i32
  }
  func.func @transform_6(%arg0: i32) -> (i32, i32) {
    %c0_i32 = arith.constant 0 : i32
    %c0_i32_0 = arith.constant 0 : i32
    %c0_i32_1 = arith.constant 0 : i32
    return %c0_i32, %c0_i32_0 : i32, i32
  }
  func.func @transform_7(%arg0: i32) -> (i32, i32) {
    %c0_i32 = arith.constant 0 : i32
    %c0_i32_0 = arith.constant 0 : i32
    return %arg0, %c0_i32 : i32, i32
  }
}

</mosaic_0001>

<bundles_post_ra>
// kernel: tpu_custom_call.1
= control target key start
LH: loop header
LB: loop body
LE: loop exit
PB: predicated region body
PF: predicated region fallthrough
CT: control target
= control target key end

     0   :  { %12 = vsyncpa [#allocation3], 0  ;;  %s610_s0 = inlined_call_operand.hbm [shape: f32[2,8], index: 0, kind: input, shape index: {}]   ;;  %s611_s1 = inlined_call_operand.hbm [shape: bf16[8,128], index: 1, kind: input, shape index: {}]   ;;  %s612_s2 = inlined_call_operand.vmem [shape: f32[1,128], index: 2, kind: input, shape index: {}]   ;;  %s613_s3 = inlined_call_operand.hbm [shape: bf16[128,128], index: 3, kind: input, shape index: {}]   ;;  %s614_s4 = inlined_call_operand.vmem [shape: f32[1,128], index: 4, kind: input, shape index: {}]   ;;  %s615_s5 = inlined_call_operand.hbm [shape: bf16[128,128], index: 5, kind: input, shape index: {}]   ;;  %s616_s6 = inlined_call_operand.vmem [shape: f32[1,128], index: 6, kind: input, shape index: {}]   ;;  %s617_s7 = inlined_call_operand.hbm [shape: f32[16,128], index: 7, kind: output, shape index: {}]  }
   0x1   :  { %13 = vsyncpa [#allocation6], 0 }
   0x2   :  { %14 = vsyncpa [#allocation9], 0 }
   0x3   :  { %15 = vsyncpa [#allocation4], 0  ;;  %s34_s26 = sshll.u32 %s611_s1, 4  ;;  %s35_s26 = int_to_ptr.hbm [resolvable:$true] %s34_s26 }
   0x4   :  { %19 = vsyncadd [#allocation3], 224  ;;  %s535_s27 = smov [#allocation5]   ;;  %s20_s8 = sshll.u32 %s610_s0, 4  ;;  %s21_s8 = int_to_ptr.hbm [resolvable:$true] %s20_s8 }
   0x5   :  { %s36_s28 = sshll.u32 %s535_s27, 4  ;;  %s536_s9 = smov [#allocation2]   ;;  %s37_s28 = int_to_ptr.vmem [resolvable:$true] %s36_s28 }
   0x6   :  { %39 = dma.hbm_to_vmem [thread:$0]  %s35_s26, 64, %s37_s28, [#allocation6]  }
   0x7   :  { %s22_s10 = sshll.u32 %s536_s9, 4  ;;  %s537_s11 = smov 32   ;;  %s23_s10 = int_to_ptr.vmem [resolvable:$true] %s22_s10 }
   0x8   :  { %s538_s12 = smov 2   ;;  %s46_s1 = sshll.u32 %s613_s3, 4  ;;  %s47_s1 = int_to_ptr.hbm [resolvable:$true] %s46_s1 }
   0x9   :  { %28 = dma.hbm_to_vmem [thread:$0]  %s21_s8, 32, %s23_s10, [#allocation3], %s537_s11, %s537_s11, %s538_s12  }
   0xa   :  { %s539_s15 = smov [#allocation7]   ;;  %s61_s0 = sshll.u32 %s615_s5, 4  ;;  %s62_s0 = int_to_ptr.hbm [resolvable:$true] %s61_s0 }
   0xb   :  { %s48_s16 = sshll.u32 %s539_s15, 4  ;;  %s540_s19 = smov 64   ;;  %s49_s16 = int_to_ptr.vmem [resolvable:$true] %s48_s16 }
   0xc   :  { %s541_s20 = smov 4   ;;  %s542_s21 = smov [#allocation8]  }
   0xd   :  { %54 = dma.hbm_to_vmem [thread:$0]  %s47_s1, 1024, %s49_s16, [#allocation6], %s540_s19, %s540_s19, %s541_s20  }
   0xe   :  { %s63_s22 = sshll.u32 %s542_s21, 4  ;;  %s64_s22 = int_to_ptr.vmem [resolvable:$true] %s63_s22 }
   0xf   :  { %69 = dma.hbm_to_vmem [thread:$0]  %s62_s0, 1024, %s64_s22, [#allocation9], %s540_s19, %s540_s19, %s541_s20  }
  0x10   :  { %527 = dma.done.wait [#allocation3], 256  }
  0x11   :  { %528 = vsyncadd [#allocation3], 4294967040 }
  0x12   :  { %529 = dma.done.wait [#allocation6], 1088  }
  0x13   :  { %530 = vsyncadd [#allocation6], 4294966208 }
  0x14   :  { %531 = dma.done.wait [#allocation9], 1024  }
  0x15   :  { %532 = vsyncadd [#allocation9], 4294966272  ;;  %vm101_vm0 = vcmask 1043456   ;;  %v92_v0 = vld [vmem:[#allocation5] sm:$0xf]  ;;  %v89_v1 = vld [vmem:[#allocation2] sm:$0xff] }
  0x16   :  { %v90_v2 = vld [vmem:[#allocation2 + $0x8] sm:$0xff]  ;;  %v103_v3 = vsel %vm101_vm0, %v92_v0, 0  ;;  %vm97_vm1 = vcmask 64512   ;;  %v382_v7 = vld [vmem:[#allocation7 + $0x28] sm:$0xff]  ;;  %v381_v8 = vld [vmem:[#allocation7 + $0x20] sm:$0xff]  ;;  %s543_s26 = smov [#allocation10]  }
  0x17   :  { %v91_v4 = vpack.c.bf16 %v90_v2, %v89_v1  ;;  %v384_v5 = vld [vmem:[#allocation7 + $0x38] sm:$0xff]  ;;  %112 = vmatpush.bf16.msra.mxu0 %v103_v3  ;;  %v383_v6 = vld [vmem:[#allocation7 + $0x30] sm:$0xff]  ;;  %v378_v11 = vld [vmem:[#allocation7 + $0x8] sm:$0xff]  ;;  %s295_s27 = sshll.u32 %s543_s26, 4  ;;  %s544_s30 = smov 128   ;;  %s296_s27 = int_to_ptr.vmem [resolvable:$true] %s295_s27 }
  0x18   :  { %190 = vmatpush.bf16.msra.mxu1 %v384_v5  ;;  %v380_v9 = vld [vmem:[#allocation7 + $0x18] sm:$0xff]  ;;  %v379_v10 = vld [vmem:[#allocation7 + $0x10] sm:$0xff]  ;;  %v377_v12 = vld [vmem:[#allocation7] sm:$0xff]  ;;  %s545_s8 = smov 8  }
  0x19   :  { %v392_v13 = vld [vmem:[#allocation8 + $0x38] sm:$0xff]  ;;  %v391_v14 = vld [vmem:[#allocation8 + $0x30] sm:$0xff]  ;;  %v390_v15 = vld [vmem:[#allocation8 + $0x28] sm:$0xff] }
  0x1a   :  { %312 = vmatmul.msk.bf16.vlgmr.msra.gmra.mxu0 %vm97_vm1, %v91_v4  ;;  %275 = vmatpush.bf16.msra.mxu2 %v392_v13  ;;  %v389_v16 = vld [vmem:[#allocation8 + $0x20] sm:$0xff]  ;;  %v404_v18 = vld [vmem:[%s612_s2] ss:$0 sm:$0xff]  ;;  %v388_v25 = vld [vmem:[#allocation8 + $0x18] sm:$0xff] }
  0x1b   :  { %v387_v26 = vld [vmem:[#allocation8 + $0x10] sm:$0xff]  ;;  %v386_v27 = vld [vmem:[#allocation8 + $0x8] sm:$0xff]  ;;  %v385_v28 = vld [vmem:[#allocation8] sm:$0xff] }
  0x1c   :  { %191 = vmatpush.bf16.msra.mxu1 %v383_v6  ;;  %v405_v30 = vld [vmem:[%s614_s4] ss:$0 sm:$0xff]  ;;  %s297_s4 = sshll.u32 %s617_s7, 4  ;;  %s298_s4 = int_to_ptr.hbm [resolvable:$true] %s297_s4 }
  0x1d   :  { %v406_v37 = vld [vmem:[%s616_s6] ss:$0 sm:$0xff] }
  0x1e   :  { %276 = vmatpush.bf16.msra.mxu2 %v391_v14 }
  0x20   :  { %192 = vmatpush.bf16.msra.mxu1 %v382_v7 }
  0x22   :  { %277 = vmatpush.bf16.msra.mxu2 %v390_v15 }
  0x24   :  { %193 = vmatpush.bf16.msra.mxu1 %v381_v8 }
  0x26   :  { %278 = vmatpush.bf16.msra.mxu2 %v389_v16 }
  0x28   :  { %194 = vmatpush.bf16.msra.mxu1 %v380_v9 }
  0x2a   :  { %279 = vmatpush.bf16.msra.mxu2 %v388_v25 }
  0x2c   :  { %195 = vmatpush.bf16.msra.mxu1 %v379_v10 }
  0x2e   :  { %280 = vmatpush.bf16.msra.mxu2 %v387_v26 }
  0x30   :  { %196 = vmatpush.bf16.msra.mxu1 %v378_v11 }
  0x32   :  { %281 = vmatpush.bf16.msra.mxu2 %v386_v27 }
  0x34   :  { %197 = vmatpush.bf16.msra.mxu1 %v377_v12 }
  0x36   :  { %282 = vmatpush.bf16.msra.mxu2 %v385_v28 }
  0x97   :  { %v114_v17 = vpop.f32.mrf.mxu0 }
  0x98   :  { %v115_v19 = vadd.f32 %v404_v18, %v114_v17 }
  0x9a   :  { %v119_v22 = vmax.f32 %v115_v19, 0.0 }
  0x9f   :  { %v116_v20 = vpop.f32.mrf.mxu0 }
  0xa0   :  { %v117_v21 = vadd.f32 %v404_v18, %v116_v20 }
  0xa2   :  { %v120_v23 = vmax.f32 %v117_v21, 0.0 }
  0xa4   :  { %v121_v24 = vpack.c.bf16 %v120_v23, %v119_v22 }
  0xa6   :  { %198 = vmatmul.bf16.vlgmr.msra.gmra.mxu1 %v121_v24 }
 0x123   :  { %v199_v29 = vpop.f32.mrf.mxu1 }
 0x124   :  { %v200_v31 = vadd.f32 %v405_v30, %v199_v29 }
 0x126   :  { %v204_v34 = vmax.f32 %v200_v31, 0.0 }
 0x12b   :  { %v201_v32 = vpop.f32.mrf.mxu1 }
 0x12c   :  { %v202_v33 = vadd.f32 %v405_v30, %v201_v32 }
 0x12e   :  { %v205_v35 = vmax.f32 %v202_v33, 0.0 }
 0x130   :  { %v206_v36 = vpack.c.bf16 %v205_v35, %v204_v34 }
 0x132   :  { %283 = vmatmul.bf16.vlgmr.msra.gmra.mxu2 %v206_v36 }
 0x1b5   :  { %v284_v38 = vpop.f32.mrf.mxu2 }
 0x1b6   :  { %v285_v39 = vadd.f32 %v406_v37, %v284_v38 }
 0x1b8   :  { %289 = vst [vmem:[#allocation10] sm:$0xff] %v285_v39 }
 0x1bd   :  { %v286_v40 = vpop.f32.mrf.mxu2 }
 0x1be   :  { %v287_v41 = vadd.f32 %v406_v37, %v286_v40 }
 0x1c0   :  { %290 = vst [vmem:[#allocation10 + $0x8] sm:$0xff] %v287_v41 }
 0x1c1   :  { %303 = dma.vmem_to_hbm [thread:$0]  %s296_s27, 256, %s298_s4, [#allocation4], %s544_s30, %s544_s30, %s545_s8  }
 0x1c2   :  { %533 = dma.done.wait [#allocation4], 256  }
 0x1c3   :  { %534 = vsyncadd [#allocation4], 4294967040 }
 0x1c4   :  { %308 = vsyncpa [#allocation3], 1 }
 0x1c5   :  { %309 = vsyncpa [#allocation6], 1 }
 0x1c6   :  { %310 = vsyncpa [#allocation9], 1 }
 0x1c7   :  { %311 = vsyncpa [#allocation4], 1 }

</bundles_post_ra>
